<compile_context>
chip_gen: v7x
topology: tpu7x:2x2x1
jax: 0.10.0
libtpu: 0.0.40
codegen_flags: <defaults>
</compile_context>

<pallas_src>
import math
import numpy as np
import jax
import jax.numpy as jnp
from jax.experimental import pallas as pl
from jax.experimental.pallas import tpu as pltpu


# --------------------------------------------------------------------------- #
# DCT operator construction (trace-time numpy constants)
# --------------------------------------------------------------------------- #
def _dct_matrix_np(n: int) -> np.ndarray:
    """C such that (C @ x) is the 1-D orthonormal DCT-II of x (norm='ortho')."""
    i = np.arange(n, dtype=np.float64)
    k = i[:, None]
    mat = np.cos(np.pi * (2.0 * i[None, :] + 1.0) * k / (2.0 * n)) * np.sqrt(2.0 / n)
    mat[0, :] *= 1.0 / np.sqrt(2.0)
    return mat


def _dct2_kron_np(w: int, h: int) -> np.ndarray:
    """D = kron(Cw, Ch): 2-D DCT on the row-major flattened (W*H,) vector."""
    return np.kron(_dct_matrix_np(w), _dct_matrix_np(h)).astype(np.float32)


# --------------------------------------------------------------------------- #
# Tiling / VMEM helpers
# --------------------------------------------------------------------------- #
def _pick_row_block(rows: int, unit: int, target: int = 2048) -> int:
    """Largest multiple of `unit` dividing `rows`, capped so that
       (a) rb <= `target` rows (VMEM budget) and
       (b) the grid has >= 2 steps when rows allow it (v7x megacore)."""
    if rows % unit != 0 or rows <= unit:
        # TODO(synk): pad rows up to a multiple of lcm(8, C) for awkward B*C
        # instead of falling back to a single full-size block.
        return rows
    n_units = rows // unit
    cap_units = max(1, min(target // unit, n_units // 2))
    best = 1
    for d_ in range(1, cap_units + 1):
        if n_units % d_ == 0:
            best = d_
    return best * unit


def _vmem_limit_bytes(streamed_block_bytes: int, resident_bytes: int) -> int:
    # double-buffered streamed blocks + (conservatively double-buffered)
    # resident blocks + headroom for internal scratch; capped at v7x's 64 MiB.
    need = 2 * streamed_block_bytes + 2 * resident_bytes + (4 << 20)
    return int(min(max(need, 32 << 20), 64 << 20))


# --------------------------------------------------------------------------- #
# Pallas kernels
# --------------------------------------------------------------------------- #
def dct_pair_kernel(x_ref, r_ref, dt_ref, ox_ref, or_ref):
    # x_ref/r_ref: (rb, WH) flattened images; dt_ref: resident (WH, WH) = D^T.
    # 2-D orthonormal DCT-II of both streams in one grid step.
    dt = dt_ref[...]
    ox_ref[...] = jnp.dot(x_ref[...], dt, preferred_element_type=jnp.float32)
    or_ref[...] = jnp.dot(r_ref[...], dt, preferred_element_type=jnp.float32)


def mix_idct_kernel(imf_ref, gath_ref, mk_ref, d_ref, o_ref):
    # EFDM forward value: imf*mk + gath*(1-mk) == gath + mk*(imf - gath)
    # mk_ref is a resident (rb, WH) block (mask tiled once in the wrapper).
    imf = imf_ref[...]
    gath = gath_ref[...]
    mixed = gath + mk_ref[...] * (imf - gath)
    # 2-D orthonormal IDCT-II: o = mixed_flat @ D  (D may be bf16; f32 accum)
    o_ref[...] = jnp.dot(mixed.astype(d_ref.dtype), d_ref[...],
                         preferred_element_type=jnp.float32)


# --------------------------------------------------------------------------- #
# pallas_call wrappers
# --------------------------------------------------------------------------- #
def dct_pair_pallas(xf, rf, d_t, rb):
    R, WH = xf.shape
    grid = (R // rb,)
    vmem = _vmem_limit_bytes(4 * rb * WH * 4, WH * WH * 4)
    ce = pl.CostEstimate(
        flops=2 * 2 * R * WH * WH,
        transcendentals=0,
        bytes_accessed=(4 * R * WH + WH * WH) * 4,
    )
    return pl.pallas_call(
        dct_pair_kernel,
        out_shape=(jax.ShapeDtypeStruct((R, WH), jnp.float32),
                   jax.ShapeDtypeStruct((R, WH), jnp.float32)),
        grid=grid,
        in_specs=[
            pl.BlockSpec((rb, WH), lambda i: (i, 0)),
            pl.BlockSpec((rb, WH), lambda i: (i, 0)),
            pl.BlockSpec((WH, WH), lambda i: (0, 0)),   # D^T: resident
        ],
        out_specs=(pl.BlockSpec((rb, WH), lambda i: (i, 0)),
                   pl.BlockSpec((rb, WH), lambda i: (i, 0))),
        compiler_params=pltpu.CompilerParams(
            dimension_semantics=("parallel",),
            vmem_limit_bytes=vmem),
        cost_estimate=ce,
    )(xf, rf, d_t)


def mix_idct_pallas(imF, gathered, mk2d, d, rb):
    R, WH = imF.shape
    C = mk2d.shape[0]
    # Tile the (C, WH) mask to exactly one row block (rb is a multiple of C and
    # every block starts at a multiple of rb, so all blocks see the same tile).
    mk_blk = jnp.broadcast_to(mk2d[None, :, :], (rb // C, C, WH)).reshape(rb, WH)
    grid = (R // rb,)
    d_bytes = WH * WH * jnp.dtype(d.dtype).itemsize
    vmem = _vmem_limit_bytes(3 * rb * WH * 4, rb * WH * 4 + d_bytes)
    ce = pl.CostEstimate(
        flops=2 * R * WH * WH + 3 * R * WH,
        transcendentals=0,
        bytes_accessed=(3 * R * WH + rb * WH) * 4 + d_bytes,
    )
    return pl.pallas_call(
        mix_idct_kernel,
        out_shape=jax.ShapeDtypeStruct((R, WH), jnp.float32),
        grid=grid,
        in_specs=[
            pl.BlockSpec((rb, WH), lambda i: (i, 0)),
            pl.BlockSpec((rb, WH), lambda i: (i, 0)),
            pl.BlockSpec((rb, WH), lambda i: (0, 0)),   # mask: resident
            pl.BlockSpec((WH, WH), lambda i: (0, 0)),   # D: resident
        ],
        out_specs=pl.BlockSpec((rb, WH), lambda i: (i, 0)),
        compiler_params=pltpu.CompilerParams(
            dimension_semantics=("parallel",),
            vmem_limit_bytes=vmem),
        cost_estimate=ce,
    )(imF, gathered, mk_blk, d)


# --------------------------------------------------------------------------- #
# Forward (FCsMix.forward with optimize=False, halfmask=True, training=True)
# --------------------------------------------------------------------------- #
def fcsmix_forward(x, ref, mk_full, *, idct_bf16=False, row_target=2048):
    B, C, W, H = x.shape
    WH = W * H
    R = B * C

    D_np = _dct2_kron_np(W, H)
    d_t = jnp.asarray(np.ascontiguousarray(D_np.T))         # (WH, WH), f32 (feeds argsort)
    d = jnp.asarray(D_np, dtype=jnp.bfloat16 if idct_bf16 else jnp.float32)

    unit = (8 * C) // math.gcd(8, C)                         # lcm(8, C)
    rb = _pick_row_block(R, unit, row_target)

    # --- fused DCT of x and ref (one pallas_call, two streams, resident D^T) ---
    xf = x.reshape(R, WH)
    rf = ref.reshape(R, WH)
    imF, reF = dct_pair_pallas(xf, rf, d_t, rb)

    # --- EFDM rank matching ---
    # TODO(synk): sort/argsort stay in XLA; there is no Pallas TPU sort primitive.
    index_content = jnp.argsort(imF, axis=-1, stable=False)
    value_style = jnp.sort(reF, axis=-1, stable=False)
    # inverse-permutation gather replaced by one O(WH) scatter:
    #   gathered[index_content[j]] = value_style[j]
    rows = jnp.arange(R, dtype=index_content.dtype)[:, None]
    gathered = jnp.zeros_like(value_style).at[rows, index_content].set(
        value_style, unique_indices=True)

    # --- EFDM mix + IDCT-2D fused in one kernel (mask resident, not streamed) ---
    mk2d = mk_full.reshape(C, WH)
    out_flat = mix_idct_pallas(imF, gathered, mk2d, d, rb)
    # module would return (None, full_mixed, None) in this config
    return out_flat.reshape(B, C, W, H)


# --------------------------------------------------------------------------- #
if __name__ == "__main__":
    B, C, W, H = 2, 4, 16, 16
    WH = W * H
    R = B * C
    key = jax.random.PRNGKey(0)
    kx, kr, km = jax.random.split(key, 3)

    x = jax.random.normal(kx, (B, C, W, H), dtype=jnp.float32)
    r = jax.random.normal(kr, (B, C, W, H), dtype=jnp.float32)
    # halfmask: torch.randint(0, 2, (C, W, H)).float()
    mk_full = jax.random.randint(km, (C, W, H), 0, 2).astype(jnp.float32)

    # Full forward (both Pallas kernels + shrunk XLA sort glue), jitted end-to-end.
    out = jax.block_until_ready(jax.jit(fcsmix_forward)(x, r, mk_full))
    assert out.shape == (B, C, W, H)
    assert bool(jnp.all(jnp.isfinite(out)))

    # ---- Stage-wise correctness checks against pure-JAX separable references.
    # (Stage-wise rather than end-to-end: tiny f32 accumulation-order deltas can
    #  flip argsort ranks at near-ties, making an end-to-end allclose flaky
    #  even when every kernel is exactly right.)
    cw = jnp.asarray(_dct_matrix_np(W).astype(np.float32))
    ch = jnp.asarray(_dct_matrix_np(H).astype(np.float32))
    D_np = _dct2_kron_np(W, H)
    d = jnp.asarray(D_np)
    d_t = jnp.asarray(np.ascontiguousarray(D_np.T))
    unit = (8 * C) // math.gcd(8, C)
    rb = _pick_row_block(R, unit)

    # Check 1: fused two-stream DCT kernel vs separable einsum reference.
    imF_p, reF_p = dct_pair_pallas(x.reshape(R, WH), r.reshape(R, WH), d_t, rb)
    imF_ref = jnp.einsum('wk,bckh,lh->bcwl', cw, x, ch).reshape(R, WH)
    reF_ref = jnp.einsum('wk,bckh,lh->bcwl', cw, r, ch).reshape(R, WH)
    assert np.allclose(np.asarray(imF_p), np.asarray(imF_ref), atol=1e-4, rtol=1e-4)
    assert np.allclose(np.asarray(reF_p), np.asarray(reF_ref), atol=1e-4, rtol=1e-4)

    # Check 2: scatter-based inverse permutation vs argsort + take_along_axis.
    idx = jnp.argsort(imF_p, axis=-1, stable=False)
    vs = jnp.sort(reF_p, axis=-1, stable=False)
    rows = jnp.arange(R, dtype=idx.dtype)[:, None]
    g_scatter = jnp.zeros_like(vs).at[rows, idx].set(vs, unique_indices=True)
    inv = jnp.argsort(idx, axis=-1)
    g_gather = jnp.take_along_axis(vs, inv, axis=-1)
    assert np.array_equal(np.asarray(g_scatter), np.asarray(g_gather))

    # Check 3: fused mix+IDCT kernel vs jnp reference on identical inputs.
    mkb = jnp.broadcast_to(mk_full.reshape(1, C, WH), (B, C, WH)).reshape(R, WH)
    mixed_ref = (imF_p * mkb + g_scatter * (1.0 - mkb)).reshape(B, C, W, H)
    out_ref = jnp.einsum('kw,bckh,hl->bcwl', cw, mixed_ref, ch)
    out_p = mix_idct_pallas(imF_p, g_scatter, mk_full.reshape(C, WH), d, rb)
    assert np.allclose(np.asarray(out_p.reshape(B, C, W, H)), np.asarray(out_ref),
                       atol=1e-4, rtol=1e-4)

    print("KERNEL_OK")
</pallas_src>

<mosaic_0001>
module attributes {stable_mosaic.version = 11 : i64} {
  func.func @dct_pair_kernel(%arg0: i32, %arg1: memref<8x256xf32, #tpu.memory_space<vmem>>, %arg2: memref<8x256xf32, #tpu.memory_space<vmem>>, %arg3: memref<256x256xf32, #tpu.memory_space<vmem>>, %arg4: memref<8x256xf32, #tpu.memory_space<vmem>>, %arg5: memref<8x256xf32, #tpu.memory_space<vmem>>) attributes {dimension_semantics = [#tpu.dimension_semantics<parallel>], iteration_bounds = array<i64: 1>, scalar_prefetch = 0 : i64, scratch_operands = 0 : i64, tpu.core_type = #tpu.core_type<tc>, window_params = [{transform_indices = @transform_0, window_bounds = array<i64: 8, 256>}, {transform_indices = @transform_1, window_bounds = array<i64: 8, 256>}, {pipeline_mode = #tpu.pipeline_mode<synchronous>, transform_indices = @transform_2, window_bounds = array<i64: 256, 256>}, {transform_indices = @transform_3, window_bounds = array<i64: 8, 256>}, {transform_indices = @transform_4, window_bounds = array<i64: 8, 256>}]} {
    %c0 = arith.constant 0 : index
    %c0_0 = arith.constant 0 : index
    %0 = vector.load %arg3[%c0, %c0_0] : memref<256x256xf32, #tpu.memory_space<vmem>>, vector<256x256xf32>
    %c0_1 = arith.constant 0 : index
    %c0_2 = arith.constant 0 : index
    %1 = vector.load %arg1[%c0_1, %c0_2] : memref<8x256xf32, #tpu.memory_space<vmem>>, vector<8x256xf32>
    %cst = arith.constant dense<0.000000e+00> : vector<8x256xf32>
    %2 = tpu.matmul %1, %0, %cst {dimension_numbers = #tpu.dot_dimension_numbers<[1], [0], [0], [1], [0, 0, 1, 1], [], []>} : vector<8x256xf32>, vector<256x256xf32>, vector<8x256xf32> -> vector<8x256xf32>
    %c0_3 = arith.constant 0 : index
    %c0_4 = arith.constant 0 : index
    %3 = vector.load %arg4[%c0_3, %c0_4] : memref<8x256xf32, #tpu.memory_space<vmem>>, vector<8x256xf32>
    tpu.vector_store %arg4[%c0_3, %c0_4], %2 {strides = array<i32>} : memref<8x256xf32, #tpu.memory_space<vmem>>, vector<8x256xf32>,
    %c0_5 = arith.constant 0 : index
    %c0_6 = arith.constant 0 : index
    %4 = vector.load %arg2[%c0_5, %c0_6] : memref<8x256xf32, #tpu.memory_space<vmem>>, vector<8x256xf32>
    %cst_7 = arith.constant dense<0.000000e+00> : vector<8x256xf32>
    %5 = tpu.matmul %4, %0, %cst_7 {dimension_numbers = #tpu.dot_dimension_numbers<[1], [0], [0], [1], [0, 0, 1, 1], [], []>} : vector<8x256xf32>, vector<256x256xf32>, vector<8x256xf32> -> vector<8x256xf32>
    %c0_8 = arith.constant 0 : index
    %c0_9 = arith.constant 0 : index
    %6 = vector.load %arg5[%c0_8, %c0_9] : memref<8x256xf32, #tpu.memory_space<vmem>>, vector<8x256xf32>
    tpu.vector_store %arg5[%c0_8, %c0_9], %5 {strides = array<i32>} : memref<8x256xf32, #tpu.memory_space<vmem>>, vector<8x256xf32>,
    return
  }
  func.func @transform_0(%arg0: i32) -> (i32, i32) {
    %c0_i32 = arith.constant 0 : i32
    %c0_i32_0 = arith.constant 0 : i32
    return %arg0, %c0_i32 : i32, i32
  }
  func.func @transform_1(%arg0: i32) -> (i32, i32) {
    %c0_i32 = arith.constant 0 : i32
    %c0_i32_0 = arith.constant 0 : i32
    return %arg0, %c0_i32 : i32, i32
  }
  func.func @transform_2(%arg0: i32) -> (i32, i32) {
    %c0_i32 = arith.constant 0 : i32
    %c0_i32_0 = arith.constant 0 : i32
    %c0_i32_1 = arith.constant 0 : i32
    return %c0_i32, %c0_i32_0 : i32, i32
  }
  func.func @transform_3(%arg0: i32) -> (i32, i32) {
    %c0_i32 = arith.constant 0 : i32
    %c0_i32_0 = arith.constant 0 : i32
    return %arg0, %c0_i32 : i32, i32
  }
  func.func @transform_4(%arg0: i32) -> (i32, i32) {
    %c0_i32 = arith.constant 0 : i32
    %c0_i32_0 = arith.constant 0 : i32
    return %arg0, %c0_i32 : i32, i32
  }
}

module attributes {stable_mosaic.version = 11 : i64} {
  func.func @mix_idct_kernel(%arg0: i32, %arg1: memref<8x256xf32, #tpu.memory_space<vmem>>, %arg2: memref<8x256xf32, #tpu.memory_space<vmem>>, %arg3: memref<8x256xf32, #tpu.memory_space<vmem>>, %arg4: memref<256x256xf32, #tpu.memory_space<vmem>>, %arg5: memref<8x256xf32, #tpu.memory_space<vmem>>) attributes {dimension_semantics = [#tpu.dimension_semantics<parallel>], iteration_bounds = array<i64: 1>, scalar_prefetch = 0 : i64, scratch_operands = 0 : i64, tpu.core_type = #tpu.core_type<tc>, window_params = [{transform_indices = @transform_0, window_bounds = array<i64: 8, 256>}, {transform_indices = @transform_1, window_bounds = array<i64: 8, 256>}, {pipeline_mode = #tpu.pipeline_mode<synchronous>, transform_indices = @transform_2, window_bounds = array<i64: 8, 256>}, {pipeline_mode = #tpu.pipeline_mode<synchronous>, transform_indices = @transform_3, window_bounds = array<i64: 256, 256>}, {transform_indices = @transform_4, window_bounds = array<i64: 8, 256>}]} {
    %c0 = arith.constant 0 : index
    %c0_0 = arith.constant 0 : index
    %0 = vector.load %arg1[%c0, %c0_0] : memref<8x256xf32, #tpu.memory_space<vmem>>, vector<8x256xf32>
    %c0_1 = arith.constant 0 : index
    %c0_2 = arith.constant 0 : index
    %1 = vector.load %arg2[%c0_1, %c0_2] : memref<8x256xf32, #tpu.memory_space<vmem>>, vector<8x256xf32>
    %c0_3 = arith.constant 0 : index
    %c0_4 = arith.constant 0 : index
    %2 = vector.load %arg3[%c0_3, %c0_4] : memref<8x256xf32, #tpu.memory_space<vmem>>, vector<8x256xf32>
    %3 = arith.subf %0, %1 : vector<8x256xf32>
    %4 = arith.mulf %2, %3 : vector<8x256xf32>
    %5 = arith.addf %1, %4 : vector<8x256xf32>
    %c0_5 = arith.constant 0 : index
    %c0_6 = arith.constant 0 : index
    %6 = vector.load %arg4[%c0_5, %c0_6] : memref<256x256xf32, #tpu.memory_space<vmem>>, vector<256x256xf32>
    %cst = arith.constant dense<0.000000e+00> : vector<8x256xf32>
    %7 = tpu.matmul %5, %6, %cst {dimension_numbers = #tpu.dot_dimension_numbers<[1], [0], [0], [1], [0, 0, 1, 1], [], []>} : vector<8x256xf32>, vector<256x256xf32>, vector<8x256xf32> -> vector<8x256xf32>
    %c0_7 = arith.constant 0 : index
    %c0_8 = arith.constant 0 : index
    %8 = vector.load %arg5[%c0_7, %c0_8] : memref<8x256xf32, #tpu.memory_space<vmem>>, vector<8x256xf32>
    tpu.vector_store %arg5[%c0_7, %c0_8], %7 {strides = array<i32>} : memref<8x256xf32, #tpu.memory_space<vmem>>, vector<8x256xf32>,
    return
  }
  func.func @transform_0(%arg0: i32) -> (i32, i32) {
    %c0_i32 = arith.constant 0 : i32
    %c0_i32_0 = arith.constant 0 : i32
    return %arg0, %c0_i32 : i32, i32
  }
  func.func @transform_1(%arg0: i32) -> (i32, i32) {
    %c0_i32 = arith.constant 0 : i32
    %c0_i32_0 = arith.constant 0 : i32
    return %arg0, %c0_i32 : i32, i32
  }
  func.func @transform_2(%arg0: i32) -> (i32, i32) {
    %c0_i32 = arith.constant 0 : i32
    %c0_i32_0 = arith.constant 0 : i32
    %c0_i32_1 = arith.constant 0 : i32
    return %c0_i32, %c0_i32_0 : i32, i32
  }
  func.func @transform_3(%arg0: i32) -> (i32, i32) {
    %c0_i32 = arith.constant 0 : i32
    %c0_i32_0 = arith.constant 0 : i32
    %c0_i32_1 = arith.constant 0 : i32
    return %c0_i32, %c0_i32_0 : i32, i32
  }
  func.func @transform_4(%arg0: i32) -> (i32, i32) {
    %c0_i32 = arith.constant 0 : i32
    %c0_i32_0 = arith.constant 0 : i32
    return %arg0, %c0_i32 : i32, i32
  }
}

</mosaic_0001>

<bundles_post_ra>
// kernel: fcsmix_forward.2
= control target key start
LH: loop header
LB: loop body
LE: loop exit
PB: predicated region body
PF: predicated region fallthrough
CT: control target
= control target key end

     0   :  { %10 = vsyncpa [#allocation3], 0  ;;  %s408_s15 = smov [#allocation2]   ;;  %s472_s0 = inlined_call_operand.vmem [shape: f32[8,256], index: 0, kind: input, shape index: {}]   ;;  %s473_s1 = inlined_call_operand.vmem [shape: f32[8,256], index: 1, kind: input, shape index: {}]   ;;  %s474_s2 = inlined_call_operand.hbm [shape: f32[256,256], index: 2, kind: input, shape index: {}]   ;;  %s475_s3 = inlined_call_operand.vmem [shape: f32[8,256], index: 3, kind: output, shape index: {0}]   ;;  %s476_s4 = inlined_call_operand.vmem [shape: f32[8,256], index: 4, kind: output, shape index: {1}]  }
   0x1   :  { %s20_s16 = sshll.u32 %s408_s15, 4  ;;  %s384_s19 = scalar_lea.hbm %s474_s2, 8192  ;;  %s21_s16 = int_to_ptr.vmem [resolvable:$true] %s20_s16 }
   0x2   :  { %p385_p0 = scmp.ne.s32.totalorder %s474_s2, %s384_s19  ;;  %p388_p1 = scmp.lt.u32.totalorder %s384_s19, %s474_s2 }
   0x4   :  { %p390_p2 = pnand %p388_p1, %p385_p0 }
   0x6   :  { %393 = shalt.err (!%p390_p2)
}
   0x7   :  { %s394_s24 = scalar_lea.vmem %s21_s16, 8192  ;;  %p399_p4 = scmp.lt.s32.totalorder %s21_s16, %s21_s16 }
   0x8   :  { %p395_p3 = scmp.ne.s32.totalorder %s21_s16, %s394_s24  ;;  %p400_p5 = scmp.lt.s32.totalorder %s394_s24, %s394_s24 }
   0xa   :  { %p401_p6 = por %p400_p5, %p399_p4 }
   0xc   :  { %p402_p7 = pnand %p401_p6, %p395_p3 }
   0xe   :  { %405 = shalt.err (!%p402_p7)
}
   0xf   :  { %s409_s25 = smov 256   ;;  %s410_s26 = smov 16  }
  0x10   :  { %26 = dma.hbm_to_vmem [thread:$0]  %s474_s2, 8192, %s21_s16, [#allocation3], %s409_s25, %s409_s25, %s410_s26  }
  0x11   :  { %406 = dma.done.wait [#allocation3], 8192  }
  0x12   :  { %407 = vsyncadd [#allocation3], 4294959104  ;;  %v31_v0 = vld [vmem:[#allocation2 + $0x8] sm:$0xff]  ;;  %v33_v1 = vld [vmem:[#allocation2 + $0x18] sm:$0xff] }
  0x13   :  { %v30_v2 = vld [vmem:[#allocation2] sm:$0xff]  ;;  %v253_v3 = vpack.c.bf16 %v33_v1, %v31_v0  ;;  %v32_v4 = vld [vmem:[#allocation2 + $0x10] sm:$0xff]  ;;  %v35_v5 = vld [vmem:[#allocation2 + $0x28] sm:$0xff] }
  0x14   :  { %v37_v6 = vld [vmem:[#allocation2 + $0x38] sm:$0xff]  ;;  %v255_v7 = vpack.c.bf16 %v32_v4, %v30_v2  ;;  %v34_v9 = vld [vmem:[#allocation2 + $0x20] sm:$0xff]  ;;  %v36_v10 = vld [vmem:[#allocation2 + $0x30] sm:$0xff] }
  0x15   :  { %v257_v8 = vpack.c.bf16 %v37_v6, %v35_v5  ;;  %v39_v11 = vld [vmem:[#allocation2 + $0x48] sm:$0xff]  ;;  %254 = vmatprep.subr.bf16.mxu0 %v253_v3  ;;  %318 = vmatprep.subr.bf16.mxu1 %v253_v3  ;;  %v41_v12 = vld [vmem:[#allocation2 + $0x58] sm:$0xff]  ;;  %v259_v13 = vpack.c.bf16 %v36_v10, %v34_v9  ;;  %v38_v15 = vld [vmem:[#allocation2 + $0x40] sm:$0xff] }
  0x16   :  { %256 = vmatpush1.bf16.msra.mxu0 %v255_v7  ;;  %320 = vmatpush1.bf16.msra.mxu1 %v255_v7  ;;  %v261_v14 = vpack.c.bf16 %v41_v12, %v39_v11  ;;  %v40_v16 = vld [vmem:[#allocation2 + $0x50] sm:$0xff]  ;;  %v43_v17 = vld [vmem:[#allocation2 + $0x68] sm:$0xff]  ;;  %v45_v18 = vld [vmem:[#allocation2 + $0x78] sm:$0xff] }
  0x17   :  { %258 = vmatprep.subr.bf16.mxu0 %v257_v8  ;;  %322 = vmatprep.subr.bf16.mxu1 %v257_v8  ;;  %v263_v19 = vpack.c.bf16 %v40_v16, %v38_v15  ;;  %v265_v20 = vpack.c.bf16 %v45_v18, %v43_v17  ;;  %v42_v21 = vld [vmem:[#allocation2 + $0x60] sm:$0xff]  ;;  %v44_v22 = vld [vmem:[#allocation2 + $0x70] sm:$0xff]  ;;  %v47_v23 = vld [vmem:[#allocation2 + $0x88] sm:$0xff] }
  0x18   :  { %v49_v24 = vld [vmem:[#allocation2 + $0x98] sm:$0xff]  ;;  %v267_v25 = vpack.c.bf16 %v44_v22, %v42_v21  ;;  %v46_v27 = vld [vmem:[#allocation2 + $0x80] sm:$0xff]  ;;  %v48_v28 = vld [vmem:[#allocation2 + $0x90] sm:$0xff] }
  0x19   :  { %v269_v26 = vpack.c.bf16 %v49_v24, %v47_v23  ;;  %v51_v29 = vld [vmem:[#allocation2 + $0xa8] sm:$0xff]  ;;  %v53_v30 = vld [vmem:[#allocation2 + $0xb8] sm:$0xff]  ;;  %v271_v31 = vpack.c.bf16 %v48_v28, %v46_v27  ;;  %v50_v33 = vld [vmem:[#allocation2 + $0xa0] sm:$0xff] }
  0x1a   :  { %260 = vmatpush1.bf16.msra.mxu0 %v259_v13  ;;  %324 = vmatpush1.bf16.msra.mxu1 %v259_v13  ;;  %v273_v32 = vpack.c.bf16 %v53_v30, %v51_v29  ;;  %v52_v34 = vld [vmem:[#allocation2 + $0xb0] sm:$0xff]  ;;  %v55_v35 = vld [vmem:[#allocation2 + $0xc8] sm:$0xff]  ;;  %v57_v36 = vld [vmem:[#allocation2 + $0xd8] sm:$0xff] }
  0x1b   :  { %262 = vmatprep.subr.bf16.mxu0 %v261_v14  ;;  %326 = vmatprep.subr.bf16.mxu1 %v261_v14  ;;  %v275_v37 = vpack.c.bf16 %v52_v34, %v50_v33  ;;  %v54_v38 = vld [vmem:[#allocation2 + $0xc0] sm:$0xff]  ;;  %v277_v39 = vpack.c.bf16 %v57_v36, %v55_v35  ;;  %v56_v40 = vld [vmem:[#allocation2 + $0xd0] sm:$0xff]  ;;  %v95_v41 = vld [vmem:[%s472_s0 + $0x8] sm:$0xff] }
  0x1c   :  { %v170_v42 = vld [vmem:[%s473_s1 + $0x8] sm:$0xff]  ;;  %v61_v44 = vld [vmem:[#allocation2 + $0xf8] sm:$0xff]  ;;  %160 = vmatprep.mubr.f32.mxu0 %v95_v41  ;;  %v279_v45 = vpack.c.bf16 %v56_v40, %v54_v38  ;;  %v58_v47 = vld [vmem:[#allocation2 + $0xe0] sm:$0xff] }
  0x1d   :  { %v59_v43 = vld [vmem:[#allocation2 + $0xe8] sm:$0xff]  ;;  %235 = vmatprep.mubr.f32.mxu1 %v170_v42  ;;  %v60_v48 = vld [vmem:[#allocation2 + $0xf0] sm:$0xff]  ;;  %v65_v50 = vld [vmem:[#allocation2 + $0x118] sm:$0xff] }
  0x1e   :  { %264 = vmatpush1.bf16.msra.mxu0 %v263_v19  ;;  %328 = vmatpush1.bf16.msra.mxu1 %v263_v19  ;;  %v281_v46 = vpack.c.bf16 %v61_v44, %v59_v43  ;;  %v63_v49 = vld [vmem:[#allocation2 + $0x108] sm:$0xff]  ;;  %v283_v51 = vpack.c.bf16 %v60_v48, %v58_v47  ;;  %v62_v53 = vld [vmem:[#allocation2 + $0x100] sm:$0xff]  ;;  %v64_v54 = vld [vmem:[#allocation2 + $0x110] sm:$0xff] }
  0x1f   :  { %266 = vmatprep.subr.bf16.mxu0 %v265_v20  ;;  %330 = vmatprep.subr.bf16.mxu1 %v265_v20  ;;  %v285_v52 = vpack.c.bf16 %v65_v50, %v63_v49  ;;  %v67_v55 = vld [vmem:[#allocation2 + $0x128] sm:$0xff]  ;;  %v69_v56 = vld [vmem:[#allocation2 + $0x138] sm:$0xff]  ;;  %v287_v57 = vpack.c.bf16 %v64_v54, %v62_v53  ;;  %v66_v59 = vld [vmem:[#allocation2 + $0x120] sm:$0xff] }
  0x20   :  { %v289_v58 = vpack.c.bf16 %v69_v56, %v67_v55  ;;  %v68_v60 = vld [vmem:[#allocation2 + $0x130] sm:$0xff]  ;;  %v71_v61 = vld [vmem:[#allocation2 + $0x148] sm:$0xff]  ;;  %v73_v62 = vld [vmem:[#allocation2 + $0x158] sm:$0xff] }
  0x21   :  { %v291_v63 = vpack.c.bf16 %v68_v60, %v66_v59  ;;  %v293_v0 = vpack.c.bf16 %v73_v62, %v71_v61  ;;  %v70_v1 = vld [vmem:[#allocation2 + $0x140] sm:$0xff]  ;;  %v72_v2 = vld [vmem:[#allocation2 + $0x150] sm:$0xff]  ;;  %v75_v3 = vld [vmem:[#allocation2 + $0x168] sm:$0xff] }
  0x22   :  { %268 = vmatpush1.bf16.msra.mxu0 %v267_v25  ;;  %332 = vmatpush1.bf16.msra.mxu1 %v267_v25  ;;  %v77_v4 = vld [vmem:[#allocation2 + $0x178] sm:$0xff]  ;;  %v295_v5 = vpack.c.bf16 %v72_v2, %v70_v1  ;;  %v74_v7 = vld [vmem:[#allocation2 + $0x160] sm:$0xff]  ;;  %v76_v8 = vld [vmem:[#allocation2 + $0x170] sm:$0xff] }
  0x23   :  { %270 = vmatprep.subr.bf16.mxu0 %v269_v26  ;;  %334 = vmatprep.subr.bf16.mxu1 %v269_v26  ;;  %v297_v6 = vpack.c.bf16 %v77_v4, %v75_v3  ;;  %v79_v9 = vld [vmem:[#allocation2 + $0x188] sm:$0xff]  ;;  %v81_v10 = vld [vmem:[#allocation2 + $0x198] sm:$0xff]  ;;  %v299_v11 = vpack.c.bf16 %v76_v8, %v74_v7  ;;  %v78_v13 = vld [vmem:[#allocation2 + $0x180] sm:$0xff] }
  0x24   :  { %v301_v12 = vpack.c.bf16 %v81_v10, %v79_v9  ;;  %v80_v14 = vld [vmem:[#allocation2 + $0x190] sm:$0xff]  ;;  %v83_v15 = vld [vmem:[#allocation2 + $0x1a8] sm:$0xff]  ;;  %v85_v16 = vld [vmem:[#allocation2 + $0x1b8] sm:$0xff] }
  0x25   :  { %v303_v17 = vpack.c.bf16 %v80_v14, %v78_v13  ;;  %v305_v18 = vpack.c.bf16 %v85_v16, %v83_v15  ;;  %v82_v19 = vld [vmem:[#allocation2 + $0x1a0] sm:$0xff]  ;;  %v84_v20 = vld [vmem:[#allocation2 + $0x1b0] sm:$0xff]  ;;  %v87_v21 = vld [vmem:[#allocation2 + $0x1c8] sm:$0xff] }
  0x26   :  { %272 = vmatpush1.bf16.msra.mxu0 %v271_v31  ;;  %336 = vmatpush1.bf16.msra.mxu1 %v271_v31  ;;  %v89_v22 = vld [vmem:[#allocation2 + $0x1d8] sm:$0xff]  ;;  %v307_v23 = vpack.c.bf16 %v84_v20, %v82_v19  ;;  %v86_v25 = vld [vmem:[#allocation2 + $0x1c0] sm:$0xff]  ;;  %v88_v26 = vld [vmem:[#allocation2 + $0x1d0] sm:$0xff] }
  0x27   :  { %274 = vmatprep.subr.bf16.mxu0 %v273_v32  ;;  %338 = vmatprep.subr.bf16.mxu1 %v273_v32  ;;  %v309_v24 = vpack.c.bf16 %v89_v22, %v87_v21  ;;  %v91_v27 = vld [vmem:[#allocation2 + $0x1e8] sm:$0xff]  ;;  %v93_v28 = vld [vmem:[#allocation2 + $0x1f8] sm:$0xff]  ;;  %v311_v29 = vpack.c.bf16 %v88_v26, %v86_v25  ;;  %v90_v31 = vld [vmem:[#allocation2 + $0x1e0] sm:$0xff] }
  0x28   :  { %v313_v30 = vpack.c.bf16 %v93_v28, %v91_v27  ;;  %v92_v32 = vld [vmem:[#allocation2 + $0x1f0] sm:$0xff]  ;;  %v94_v34 = vld [vmem:[%s472_s0] sm:$0xff] }
  0x29   :  { %v315_v33 = vpack.c.bf16 %v92_v32, %v90_v31  ;;  %v169_v35 = vld [vmem:[%s473_s1] sm:$0xff] }
  0x2a   :  { %276 = vmatpush1.bf16.msra.mxu0 %v275_v37  ;;  %340 = vmatpush1.bf16.msra.mxu1 %v275_v37 }
  0x2b   :  { %278 = vmatprep.subr.bf16.mxu0 %v277_v39  ;;  %342 = vmatprep.subr.bf16.mxu1 %v277_v39 }
  0x2e   :  { %280 = vmatpush1.bf16.msra.mxu0 %v279_v45  ;;  %344 = vmatpush1.bf16.msra.mxu1 %v279_v45 }
  0x2f   :  { %282 = vmatprep.subr.bf16.mxu0 %v281_v46  ;;  %346 = vmatprep.subr.bf16.mxu1 %v281_v46 }
  0x32   :  { %284 = vmatpush1.bf16.msra.mxu0 %v283_v51  ;;  %348 = vmatpush1.bf16.msra.mxu1 %v283_v51 }
  0x33   :  { %286 = vmatprep.subr.bf16.mxu0 %v285_v52  ;;  %350 = vmatprep.subr.bf16.mxu1 %v285_v52 }
  0x36   :  { %288 = vmatpush1.bf16.msra.mxu0 %v287_v57  ;;  %352 = vmatpush1.bf16.msra.mxu1 %v287_v57 }
  0x37   :  { %290 = vmatprep.subr.bf16.mxu0 %v289_v58  ;;  %354 = vmatprep.subr.bf16.mxu1 %v289_v58 }
  0x3a   :  { %292 = vmatpush1.bf16.msra.mxu0 %v291_v63  ;;  %356 = vmatpush1.bf16.msra.mxu1 %v291_v63 }
  0x3b   :  { %294 = vmatprep.subr.bf16.mxu0 %v293_v0  ;;  %358 = vmatprep.subr.bf16.mxu1 %v293_v0 }
  0x3e   :  { %296 = vmatpush1.bf16.msra.mxu0 %v295_v5  ;;  %360 = vmatpush1.bf16.msra.mxu1 %v295_v5 }
  0x3f   :  { %298 = vmatprep.subr.bf16.mxu0 %v297_v6  ;;  %362 = vmatprep.subr.bf16.mxu1 %v297_v6 }
  0x42   :  { %300 = vmatpush1.bf16.msra.mxu0 %v299_v11  ;;  %364 = vmatpush1.bf16.msra.mxu1 %v299_v11 }
  0x43   :  { %302 = vmatprep.subr.bf16.mxu0 %v301_v12  ;;  %366 = vmatprep.subr.bf16.mxu1 %v301_v12 }
  0x46   :  { %304 = vmatpush1.bf16.msra.mxu0 %v303_v17  ;;  %368 = vmatpush1.bf16.msra.mxu1 %v303_v17 }
  0x47   :  { %306 = vmatprep.subr.bf16.mxu0 %v305_v18  ;;  %370 = vmatprep.subr.bf16.mxu1 %v305_v18 }
  0x4a   :  { %308 = vmatpush1.bf16.msra.mxu0 %v307_v23  ;;  %372 = vmatpush1.bf16.msra.mxu1 %v307_v23 }
  0x4b   :  { %310 = vmatprep.subr.bf16.mxu0 %v309_v24  ;;  %374 = vmatprep.subr.bf16.mxu1 %v309_v24 }
  0x4e   :  { %312 = vmatpush1.bf16.msra.mxu0 %v311_v29  ;;  %376 = vmatpush1.bf16.msra.mxu1 %v311_v29 }
  0x4f   :  { %314 = vmatprep.subr.bf16.mxu0 %v313_v30  ;;  %378 = vmatprep.subr.bf16.mxu1 %v313_v30 }
  0x52   :  { %316 = vmatpush1.bf16.msra.mxu0 %v315_v33  ;;  %380 = vmatpush1.bf16.msra.mxu1 %v315_v33 }
  0x55   :  { %161 = vmatmul.mubr.f32.vlgmr.msra.gmra.mrb[0].mxu0 %v94_v34  ;;  %236 = vmatmul.mubr.f32.vlgmr.msra.gmra.mrb[0].mxu1 %v169_v35 }
 0x128   :  { %v162_v36 = vpop.f32.mrb[0].mxu0  ;;  %v237_v37 = vpop.f32.mrb[0].mxu1 }
 0x129   :  { %167 = vst [vmem:[%s475_s3] sm:$0xff] %v162_v36  ;;  %242 = vst [vmem:[%s476_s4] sm:$0xff] %v237_v37  ;;  %v164_v38 = vpop.f32.mrb[1].mxu0  ;;  %v239_v39 = vpop.f32.mrb[1].mxu1 }
 0x12a   :  { %168 = vst [vmem:[%s475_s3 + $0x8] sm:$0xff] %v164_v38  ;;  %243 = vst [vmem:[%s476_s4 + $0x8] sm:$0xff] %v239_v39 }
 0x12b   :  { %252 = vsyncpa [#allocation3], 1 }

// kernel: fcsmix_forward.3
= control target key start
LH: loop header
LB: loop body
LE: loop exit
PB: predicated region body
PF: predicated region fallthrough
CT: control target
= control target key end

     0   :  { %s475_s3 = inlined_call_operand.vmem [shape: f32[256,256], index: 3, kind: input, shape index: {}]   ;;  %s476_s0 = inlined_call_operand.vmem [shape: f32[8,256], index: 0, kind: input, shape index: {}]   ;;  %s477_s1 = inlined_call_operand.vmem [shape: f32[8,256], index: 1, kind: input, shape index: {}]   ;;  %s478_s2 = inlined_call_operand.vmem [shape: f32[8,256], index: 2, kind: input, shape index: {}]   ;;  %s479_s4 = inlined_call_operand.vmem [shape: f32[8,256], index: 4, kind: output, shape index: {}]  }
   0x1   :  { %v30_v0 = vld [vmem:[%s475_s3 + $0x8] sm:$0xff]  ;;  %v32_v1 = vld [vmem:[%s475_s3 + $0x18] sm:$0xff]  ;;  %v29_v2 = vld [vmem:[%s475_s3] sm:$0xff] }
   0x2   :  { %v170_v3 = vpack.c.bf16 %v32_v1, %v30_v0  ;;  %v31_v4 = vld [vmem:[%s475_s3 + $0x10] sm:$0xff]  ;;  %v34_v5 = vld [vmem:[%s475_s3 + $0x28] sm:$0xff]  ;;  %v36_v6 = vld [vmem:[%s475_s3 + $0x38] sm:$0xff] }
   0x3   :  { %v172_v7 = vpack.c.bf16 %v31_v4, %v29_v2  ;;  %v174_v8 = vpack.c.bf16 %v36_v6, %v34_v5  ;;  %v33_v9 = vld [vmem:[%s475_s3 + $0x20] sm:$0xff]  ;;  %v35_v10 = vld [vmem:[%s475_s3 + $0x30] sm:$0xff]  ;;  %v38_v11 = vld [vmem:[%s475_s3 + $0x48] sm:$0xff] }
   0x4   :  { %171 = vmatprep.subr.bf16.mxu0 %v170_v3  ;;  %v40_v12 = vld [vmem:[%s475_s3 + $0x58] sm:$0xff]  ;;  %v176_v13 = vpack.c.bf16 %v35_v10, %v33_v9  ;;  %v37_v15 = vld [vmem:[%s475_s3 + $0x40] sm:$0xff]  ;;  %v39_v16 = vld [vmem:[%s475_s3 + $0x50] sm:$0xff] }
   0x5   :  { %173 = vmatpush1.bf16.msra.mxu0 %v172_v7  ;;  %v178_v14 = vpack.c.bf16 %v40_v12, %v38_v11  ;;  %v42_v17 = vld [vmem:[%s475_s3 + $0x68] sm:$0xff]  ;;  %v44_v18 = vld [vmem:[%s475_s3 + $0x78] sm:$0xff]  ;;  %v180_v19 = vpack.c.bf16 %v39_v16, %v37_v15  ;;  %v41_v21 = vld [vmem:[%s475_s3 + $0x60] sm:$0xff] }
   0x6   :  { %175 = vmatprep.subr.bf16.mxu0 %v174_v8  ;;  %v182_v20 = vpack.c.bf16 %v44_v18, %v42_v17  ;;  %v43_v22 = vld [vmem:[%s475_s3 + $0x70] sm:$0xff]  ;;  %v46_v23 = vld [vmem:[%s475_s3 + $0x88] sm:$0xff]  ;;  %v48_v24 = vld [vmem:[%s475_s3 + $0x98] sm:$0xff] }
   0x7   :  { %v184_v25 = vpack.c.bf16 %v43_v22, %v41_v21  ;;  %v186_v26 = vpack.c.bf16 %v48_v24, %v46_v23  ;;  %v45_v27 = vld [vmem:[%s475_s3 + $0x80] sm:$0xff]  ;;  %v47_v28 = vld [vmem:[%s475_s3 + $0x90] sm:$0xff]  ;;  %v50_v29 = vld [vmem:[%s475_s3 + $0xa8] sm:$0xff] }
   0x8   :  { %v52_v30 = vld [vmem:[%s475_s3 + $0xb8] sm:$0xff]  ;;  %v188_v31 = vpack.c.bf16 %v47_v28, %v45_v27  ;;  %v49_v33 = vld [vmem:[%s475_s3 + $0xa0] sm:$0xff]  ;;  %v51_v34 = vld [vmem:[%s475_s3 + $0xb0] sm:$0xff] }
   0x9   :  { %177 = vmatpush1.bf16.msra.mxu0 %v176_v13  ;;  %v190_v32 = vpack.c.bf16 %v52_v30, %v50_v29  ;;  %v54_v35 = vld [vmem:[%s475_s3 + $0xc8] sm:$0xff]  ;;  %v56_v36 = vld [vmem:[%s475_s3 + $0xd8] sm:$0xff]  ;;  %v192_v37 = vpack.c.bf16 %v51_v34, %v49_v33  ;;  %v53_v39 = vld [vmem:[%s475_s3 + $0xc0] sm:$0xff] }
   0xa   :  { %179 = vmatprep.subr.bf16.mxu0 %v178_v14  ;;  %v194_v38 = vpack.c.bf16 %v56_v36, %v54_v35  ;;  %v55_v40 = vld [vmem:[%s475_s3 + $0xd0] sm:$0xff]  ;;  %v18_v41 = vld [vmem:[%s476_s0 + $0x8] sm:$0xff]  ;;  %v60_v43 = vld [vmem:[%s475_s3 + $0xf8] sm:$0xff] }
   0xb   :  { %v58_v42 = vld [vmem:[%s475_s3 + $0xe8] sm:$0xff]  ;;  %v196_v47 = vpack.c.bf16 %v55_v40, %v53_v39  ;;  %v57_v49 = vld [vmem:[%s475_s3 + $0xe0] sm:$0xff]  ;;  %v59_v50 = vld [vmem:[%s475_s3 + $0xf0] sm:$0xff] }
   0xc   :  { %v20_v44 = vld [vmem:[%s477_s1 + $0x8] sm:$0xff]  ;;  %v198_v48 = vpack.c.bf16 %v60_v43, %v58_v42  ;;  %v64_v53 = vld [vmem:[%s475_s3 + $0x118] sm:$0xff]  ;;  %v200_v55 = vpack.c.bf16 %v59_v50, %v57_v49  ;;  %v61_v57 = vld [vmem:[%s475_s3 + $0x100] sm:$0xff] }
   0xd   :  { %181 = vmatpush1.bf16.msra.mxu0 %v180_v19  ;;  %v22_v45 = vld [vmem:[%s478_s2 + $0x8] sm:$0xff]  ;;  %v24_v46 = vsub.f32 %v18_v41, %v20_v44  ;;  %v63_v58 = vld [vmem:[%s475_s3 + $0x110] sm:$0xff]  ;;  %v68_v60 = vld [vmem:[%s475_s3 + $0x138] sm:$0xff] }
   0xe   :  { %183 = vmatprep.subr.bf16.mxu0 %v182_v20  ;;  %v62_v52 = vld [vmem:[%s475_s3 + $0x108] sm:$0xff]  ;;  %v204_v61 = vpack.c.bf16 %v63_v58, %v61_v57  ;;  %v65_v63 = vld [vmem:[%s475_s3 + $0x120] sm:$0xff]  ;;  %v67_v0 = vld [vmem:[%s475_s3 + $0x130] sm:$0xff] }
   0xf   :  { %v26_v51 = vmul.f32 %v24_v46, %v22_v45  ;;  %v202_v56 = vpack.c.bf16 %v64_v53, %v62_v52  ;;  %v66_v59 = vld [vmem:[%s475_s3 + $0x128] sm:$0xff]  ;;  %v72_v2 = vld [vmem:[%s475_s3 + $0x158] sm:$0xff]  ;;  %v208_v3 = vpack.c.bf16 %v67_v0, %v65_v63  ;;  %v69_v5 = vld [vmem:[%s475_s3 + $0x140] sm:$0xff] }
  0x10   :  { %v206_v62 = vpack.c.bf16 %v68_v60, %v66_v59  ;;  %v70_v1 = vld [vmem:[%s475_s3 + $0x148] sm:$0xff]  ;;  %v71_v6 = vld [vmem:[%s475_s3 + $0x150] sm:$0xff]  ;;  %v76_v8 = vld [vmem:[%s475_s3 + $0x178] sm:$0xff] }
  0x11   :  { %185 = vmatpush1.bf16.msra.mxu0 %v184_v25  ;;  %v28_v54 = vadd.f32 %v26_v51, %v20_v44  ;;  %v210_v4 = vpack.c.bf16 %v72_v2, %v70_v1  ;;  %v74_v7 = vld [vmem:[%s475_s3 + $0x168] sm:$0xff]  ;;  %v212_v9 = vpack.c.bf16 %v71_v6, %v69_v5  ;;  %v73_v11 = vld [vmem:[%s475_s3 + $0x160] sm:$0xff]  ;;  %v75_v12 = vld [vmem:[%s475_s3 + $0x170] sm:$0xff] }
  0x12   :  { %187 = vmatprep.subr.bf16.mxu0 %v186_v26  ;;  %v214_v10 = vpack.c.bf16 %v76_v8, %v74_v7  ;;  %v78_v13 = vld [vmem:[%s475_s3 + $0x188] sm:$0xff]  ;;  %v80_v14 = vld [vmem:[%s475_s3 + $0x198] sm:$0xff]  ;;  %v216_v15 = vpack.c.bf16 %v75_v12, %v73_v11  ;;  %v77_v17 = vld [vmem:[%s475_s3 + $0x180] sm:$0xff] }
  0x13   :  { %157 = vmatprep.mubr.f32.mxu0 %v28_v54  ;;  %v218_v16 = vpack.c.bf16 %v80_v14, %v78_v13  ;;  %v79_v18 = vld [vmem:[%s475_s3 + $0x190] sm:$0xff]  ;;  %v82_v19 = vld [vmem:[%s475_s3 + $0x1a8] sm:$0xff]  ;;  %v84_v20 = vld [vmem:[%s475_s3 + $0x1b8] sm:$0xff] }
  0x14   :  { %v220_v21 = vpack.c.bf16 %v79_v18, %v77_v17  ;;  %v222_v22 = vpack.c.bf16 %v84_v20, %v82_v19  ;;  %v81_v23 = vld [vmem:[%s475_s3 + $0x1a0] sm:$0xff]  ;;  %v83_v24 = vld [vmem:[%s475_s3 + $0x1b0] sm:$0xff]  ;;  %v86_v25 = vld [vmem:[%s475_s3 + $0x1c8] sm:$0xff] }
  0x15   :  { %189 = vmatpush1.bf16.msra.mxu0 %v188_v31  ;;  %v88_v26 = vld [vmem:[%s475_s3 + $0x1d8] sm:$0xff]  ;;  %v224_v27 = vpack.c.bf16 %v83_v24, %v81_v23  ;;  %v17_v28 = vld [vmem:[%s476_s0] sm:$0xff]  ;;  %v90_v33 = vld [vmem:[%s475_s3 + $0x1e8] sm:$0xff] }
  0x16   :  { %191 = vmatprep.subr.bf16.mxu0 %v190_v32  ;;  %v19_v29 = vld [vmem:[%s477_s1] sm:$0xff]  ;;  %v226_v30 = vpack.c.bf16 %v88_v26, %v86_v25  ;;  %v87_v32 = vld [vmem:[%s475_s3 + $0x1d0] sm:$0xff]  ;;  %v92_v34 = vld [vmem:[%s475_s3 + $0x1f8] sm:$0xff] }
  0x17   :  { %v85_v31 = vld [vmem:[%s475_s3 + $0x1c0] sm:$0xff]  ;;  %v23_v35 = vsub.f32 %v17_v28, %v19_v29  ;;  %v91_v40 = vld [vmem:[%s475_s3 + $0x1f0] sm:$0xff] }
  0x18   :  { %v228_v36 = vpack.c.bf16 %v87_v32, %v85_v31  ;;  %v89_v39 = vld [vmem:[%s475_s3 + $0x1e0] sm:$0xff] }
  0x19   :  { %193 = vmatpush1.bf16.msra.mxu0 %v192_v37  ;;  %v21_v37 = vld [vmem:[%s478_s2] sm:$0xff]  ;;  %v232_v42 = vpack.c.bf16 %v91_v40, %v89_v39 }
  0x1a   :  { %195 = vmatprep.subr.bf16.mxu0 %v194_v38  ;;  %v230_v38 = vpack.c.bf16 %v92_v34, %v90_v33  ;;  %v25_v41 = vmul.f32 %v23_v35, %v21_v37 }
  0x1c   :  { %v27_v43 = vadd.f32 %v25_v41, %v19_v29 }
  0x1d   :  { %197 = vmatpush1.bf16.msra.mxu0 %v196_v47 }
  0x1e   :  { %199 = vmatprep.subr.bf16.mxu0 %v198_v48 }
  0x21   :  { %201 = vmatpush1.bf16.msra.mxu0 %v200_v55 }
  0x22   :  { %203 = vmatprep.subr.bf16.mxu0 %v202_v56 }
  0x25   :  { %205 = vmatpush1.bf16.msra.mxu0 %v204_v61 }
  0x26   :  { %207 = vmatprep.subr.bf16.mxu0 %v206_v62 }
  0x29   :  { %209 = vmatpush1.bf16.msra.mxu0 %v208_v3 }
  0x2a   :  { %211 = vmatprep.subr.bf16.mxu0 %v210_v4 }
  0x2d   :  { %213 = vmatpush1.bf16.msra.mxu0 %v212_v9 }
  0x2e   :  { %215 = vmatprep.subr.bf16.mxu0 %v214_v10 }
  0x31   :  { %217 = vmatpush1.bf16.msra.mxu0 %v216_v15 }
  0x32   :  { %219 = vmatprep.subr.bf16.mxu0 %v218_v16 }
  0x35   :  { %221 = vmatpush1.bf16.msra.mxu0 %v220_v21 }
  0x36   :  { %223 = vmatprep.subr.bf16.mxu0 %v222_v22 }
  0x39   :  { %225 = vmatpush1.bf16.msra.mxu0 %v224_v27 }
  0x3a   :  { %227 = vmatprep.subr.bf16.mxu0 %v226_v30 }
  0x3d   :  { %229 = vmatpush1.bf16.msra.mxu0 %v228_v36 }
  0x3e   :  { %231 = vmatprep.subr.bf16.mxu0 %v230_v38 }
  0x41   :  { %233 = vmatpush1.bf16.msra.mxu0 %v232_v42 }
  0x44   :  { %158 = vmatmul.mubr.f32.vlgmr.msra.gmra.mrb[0].mxu0 %v27_v43 }
 0x117   :  { %v159_v44 = vpop.f32.mrb[0].mxu0 }
 0x118   :  { %164 = vst [vmem:[%s479_s4] sm:$0xff] %v159_v44  ;;  %v161_v45 = vpop.f32.mrb[1].mxu0 }
 0x119   :  { %165 = vst [vmem:[%s479_s4 + $0x8] sm:$0xff] %v161_v45 }

</bundles_post_ra>
